<compile_context>
chip_gen: v7x
topology: tpu7x:2x2x1
jax: 0.10.0
libtpu: 0.0.40
codegen_flags: <defaults>
</compile_context>

<pallas_src>
import jax
import jax.numpy as jnp
from jax.experimental import pallas as pl
from jax.experimental.pallas import tpu as pltpu


_LANE = 128
# Keep the (Np, TJ) f32 mask slab under ~4 MiB: fits comfortably inside the explicit
# 32 MiB scoped-VMEM limit on every generation (v5e/v6e 128 MiB, v7x 64 MiB physical),
# with headroom for double-buffered blocked inputs/outputs and resident operands.
_SLAB_BUDGET_BYTES = 4 * 1024 * 1024


def _cox_nll_kernel(lhs_ref, y_col_ref, y_blk_ref, rps_blk_ref, e_blk_ref, out_ref):
    """One lane-dense column block of the Cox partial-likelihood loss.

    lhs_ref:     (8, Np)  rows: [exp(rp - m) * valid, valid, 0, ..., 0]   (resident)
    y_col_ref:   (Np, 1)  survival times, column form (reduction axis i)  (resident)
    y_blk_ref:   (1, TJ)  survival times for this column block (axis j)
    rps_blk_ref: (1, TJ)  risk_pred - m for this column block
    e_blk_ref:   (1, TJ)  event indicators for this column block
    out_ref:     (1, TJ)  per-subject contribution (risk_pred - log_loss) * e
    """
    # Risk-set mask slab: mask[i, jj] = 1 iff y[j] <= y[i]
    # (identical to the reference's "mask[y.T - y > 0] = 0").
    mask = (y_blk_ref[...] <= y_col_ref[...]).astype(jnp.float32)          # (Np, TJ)

    # Both axis-0 reductions in a single MXU matmul:
    #   row 0: num[j] = sum_i exp(rp_i - m) * valid_i * mask[i, j]
    #   row 1: den[j] = sum_i valid_i * mask[i, j]
    nd = jnp.dot(lhs_ref[...], mask, preferred_element_type=jnp.float32)   # (8, TJ)
    num = nd[0:1, :]
    den = nd[1:2, :]

    # log_loss - m == log(num) - log(den)   (EUP path; avoids the f32 vector divide)
    log_loss_shifted = jnp.log(num) - jnp.log(den)

    e_blk = e_blk_ref[...]
    contrib = (rps_blk_ref[...] - log_loss_shifted) * e_blk
    # e == 0 columns (censored subjects and lane padding) contribute exactly zero;
    # the select also shields the final sum from inf/nan in empty padded columns.
    out_ref[...] = jnp.where(e_blk != 0.0, contrib, 0.0)


def _column_tiling(n):
    """Pick a lane-dense column tile TJ (multiple of 128) and padded length Np."""
    n_lane = max(_LANE, -(-n // _LANE) * _LANE)
    tj = 512
    while tj > _LANE and (tj > n_lane or n_lane * tj * 4 > _SLAB_BUDGET_BYTES):
        tj //= 2
    n_pad = -(-n // tj) * tj
    return n_pad, tj


def _cox_nll_pallas(risk_pred, y, e):
    """-sum((risk_pred - log_loss) * e), computed with the Pallas kernel."""
    n = risk_pred.shape[0]
    n_pad, tj = _column_tiling(n)
    pad = n_pad - n

    rp = risk_pred.reshape(-1).astype(jnp.float32)
    yv = y.reshape(-1).astype(jnp.float32)
    ev = e.reshape(-1).astype(jnp.float32)

    # Stabilize the exponential: work with rp - m; the shift cancels analytically in
    # (rp - log_loss), so the result is identical to the unstabilized reference.
    m = jnp.max(rp)
    rps = rp - m

    rps_row = jnp.pad(rps, (0, pad)).reshape(1, n_pad)
    y_row = jnp.pad(yv, (0, pad)).reshape(1, n_pad)
    e_row = jnp.pad(ev, (0, pad)).reshape(1, n_pad)              # padded e == 0
    valid = jnp.pad(jnp.ones((n,), jnp.float32), (0, pad)).reshape(1, n_pad)
    y_col = y_row.reshape(n_pad, 1)

    # Sublane-aligned 8-row MXU LHS (O(N) prep, plain-JAX glue).
    lhs = jnp.concatenate(
        [jnp.exp(rps_row) * valid, valid, jnp.zeros((6, n_pad), jnp.float32)],
        axis=0)                                                   # (8, Np)

    contrib = pl.pallas_call(
        _cox_nll_kernel,
        out_shape=jax.ShapeDtypeStruct((1, n_pad), jnp.float32),
        grid=(n_pad // tj,),
        in_specs=[
            pl.BlockSpec((8, n_pad), lambda j: (0, 0)),          # resident across j
            pl.BlockSpec((n_pad, 1), lambda j: (0, 0)),          # resident across j
            pl.BlockSpec((1, tj), lambda j: (0, j)),
            pl.BlockSpec((1, tj), lambda j: (0, j)),
            pl.BlockSpec((1, tj), lambda j: (0, j)),
        ],
        out_specs=pl.BlockSpec((1, tj), lambda j: (0, j)),
        compiler_params=pltpu.CompilerParams(
            # Column blocks are fully independent -> shardable across the two
            # TensorCores on v7x; harmless no-op on single-TC v5e/v6e.
            dimension_semantics=("parallel",),
            vmem_limit_bytes=32 * 1024 * 1024,
        ),
    )(lhs, y_col, y_row, rps_row, e_row)

    # TODO(synk): for very large N (>~32K) additionally block the row (i) axis as an
    # "arbitrary" reduction grid axis (or pre-sort by y and replace the mask with a
    # suffix cumulative sum, removing the O(N^2) work entirely).
    return -jnp.sum(contrib)


def _cox_nll_reference(risk_pred, y, e):
    """Pure-JAX mirror of the PyTorch forward (used for tiny batches & checking)."""
    risk_pred = risk_pred.astype(jnp.float32)
    y = y.astype(jnp.float32)
    e = e.astype(jnp.float32)
    mask = jnp.where((y.T - y) > 0, 0.0, 1.0)
    log_loss = jnp.exp(risk_pred) * mask
    log_loss = jnp.sum(log_loss, axis=0) / jnp.sum(mask, axis=0)
    log_loss = jnp.log(log_loss).reshape(-1, 1)
    return -jnp.sum((risk_pred - log_loss) * e)


def negative_log_likelihood(risk_pred, y, e, model_params=None, weight_decay=0.0,
                            use_kernel=None):
    """risk_pred, y, e: (N, 1) float arrays. model_params: dict name -> array."""
    n = risk_pred.shape[0]
    if use_kernel is None:
        # pallas_call/DMA setup overhead dwarfs the math below the (8,128) tile scale;
        # the O(N^2) kernel only pays off at larger batches.
        use_kernel = n >= 256

    if use_kernel:
        neg_log_loss = _cox_nll_pallas(risk_pred, y, e)
    else:
        neg_log_loss = _cox_nll_reference(risk_pred, y, e)

    # Regularization(order=2, weight_decay=self.L2_reg) with L2_reg = 0.0:
    # contributes exactly zero; computed in plain-JAX glue for fidelity.
    reg_loss = jnp.float32(0.0)
    if model_params is not None:
        for name, w in model_params.items():
            if "weight" in name:
                w = w.astype(jnp.float32)
                reg_loss = reg_loss + jnp.linalg.norm(
                    w, ord=2 if w.ndim == 1 else "fro")
    return neg_log_loss + jnp.float32(weight_decay) * reg_loss


if __name__ == "__main__":
    key = jax.random.PRNGKey(0)
    k_param = jax.random.fold_in(key, 999)

    # Deterministic synthetic "model" parameters (only feed the L2 term, whose
    # weight_decay is 0.0 in the original module).
    model_params = {
        "fc1.weight": jax.random.normal(k_param, (32, 16), jnp.float32) * 0.05,
        "fc1.bias": jnp.zeros((32,), jnp.float32),
    }

    ok = True
    # N=8 exercises heavy lane padding; N=300 pads to 512 and runs a 2-block grid.
    for n in (8, 300):
        k1, k2, k3 = jax.random.split(jax.random.fold_in(key, n), 3)
        risk_pred = jax.random.normal(k1, (n, 1), jnp.float32)           # risk scores
        yy = jax.random.uniform(k2, (n, 1), jnp.float32, 0.0, 10.0)      # surv. times
        ee = (jax.random.uniform(k3, (n, 1)) > 0.3).astype(jnp.float32)  # events

        loss = negative_log_likelihood(risk_pred, yy, ee, model_params,
                                       weight_decay=0.0, use_kernel=True)
        loss = jax.block_until_ready(loss)
        ref = _cox_nll_reference(risk_pred, yy, ee)
        if not jnp.allclose(loss, ref, rtol=1e-4, atol=1e-3):
            ok = False
            print("MISMATCH at N =", n, float(loss), float(ref))

    if ok:
        print("KERNEL_OK")
</pallas_src>

<mosaic_0001>
module attributes {stable_mosaic.version = 11 : i64} {
  func.func @_cox_nll_kernel(%arg0: i32, %arg1: memref<8x128xf32, #tpu.memory_space<vmem>>, %arg2: memref<128x1xf32, #tpu.memory_space<vmem>>, %arg3: memref<1x128xf32, #tpu.memory_space<vmem>>, %arg4: memref<1x128xf32, #tpu.memory_space<vmem>>, %arg5: memref<1x128xf32, #tpu.memory_space<vmem>>, %arg6: memref<1x128xf32, #tpu.memory_space<vmem>>) attributes {dimension_semantics = [#tpu.dimension_semantics<parallel>], iteration_bounds = array<i64: 1>, scalar_prefetch = 0 : i64, scratch_operands = 0 : i64, tpu.core_type = #tpu.core_type<tc>, window_params = [{pipeline_mode = #tpu.pipeline_mode<synchronous>, transform_indices = @transform_0, window_bounds = array<i64: 8, 128>}, {pipeline_mode = #tpu.pipeline_mode<synchronous>, transform_indices = @transform_1, window_bounds = array<i64: 128, 1>}, {transform_indices = @transform_2, window_bounds = array<i64: 1, 128>}, {transform_indices = @transform_3, window_bounds = array<i64: 1, 128>}, {transform_indices = @transform_4, window_bounds = array<i64: 1, 128>}, {transform_indices = @transform_5, window_bounds = array<i64: 1, 128>}]} {
    %c0 = arith.constant 0 : index
    %c0_0 = arith.constant 0 : index
    %0 = vector.load %arg3[%c0, %c0_0] : memref<1x128xf32, #tpu.memory_space<vmem>>, vector<1x128xf32>
    %c0_1 = arith.constant 0 : index
    %c0_2 = arith.constant 0 : index
    %1 = vector.load %arg2[%c0_1, %c0_2] : memref<128x1xf32, #tpu.memory_space<vmem>>, vector<128x1xf32>
    %2 = vector.broadcast %0 : vector<1x128xf32> to vector<128x128xf32>
    %3 = vector.broadcast %1 : vector<128x1xf32> to vector<128x128xf32>
    %4 = arith.cmpf ole, %2, %3 : vector<128x128xf32>
    %5 = arith.extui %4 : vector<128x128xi1> to vector<128x128xi32>
    %6 = arith.sitofp %5 : vector<128x128xi32> to vector<128x128xf32>
    %c0_3 = arith.constant 0 : index
    %c0_4 = arith.constant 0 : index
    %7 = vector.load %arg1[%c0_3, %c0_4] : memref<8x128xf32, #tpu.memory_space<vmem>>, vector<8x128xf32>
    %cst = arith.constant dense<0.000000e+00> : vector<8x128xf32>
    %8 = tpu.matmul %7, %6, %cst {dimension_numbers = #tpu.dot_dimension_numbers<[1], [0], [0], [1], [0, 0, 1, 1], [], []>} : vector<8x128xf32>, vector<128x128xf32>, vector<8x128xf32> -> vector<8x128xf32>
    %9 = vector.extract_strided_slice %8 {offsets = [0, 0], sizes = [1, 128], strides = [1, 1]} : vector<8x128xf32> to vector<1x128xf32>
    %10 = vector.extract_strided_slice %8 {offsets = [1, 0], sizes = [1, 128], strides = [1, 1]} : vector<8x128xf32> to vector<1x128xf32>
    %11 = math.log %9 : vector<1x128xf32>
    %12 = math.log %10 : vector<1x128xf32>
    %13 = arith.subf %11, %12 : vector<1x128xf32>
    %c0_5 = arith.constant 0 : index
    %c0_6 = arith.constant 0 : index
    %14 = vector.load %arg5[%c0_5, %c0_6] : memref<1x128xf32, #tpu.memory_space<vmem>>, vector<1x128xf32>
    %c0_7 = arith.constant 0 : index
    %c0_8 = arith.constant 0 : index
    %15 = vector.load %arg4[%c0_7, %c0_8] : memref<1x128xf32, #tpu.memory_space<vmem>>, vector<1x128xf32>
    %16 = arith.subf %15, %13 : vector<1x128xf32>
    %17 = arith.mulf %16, %14 : vector<1x128xf32>
    %cst_9 = arith.constant 0.000000e+00 : f32
    %18 = vector.broadcast %cst_9 : f32 to vector<1x128xf32>
    %19 = arith.cmpf one, %14, %18 : vector<1x128xf32>
    %cst_10 = arith.constant 0.000000e+00 : f32
    %20 = vector.broadcast %cst_10 : f32 to vector<1x128xf32>
    %21 = arith.select %19, %17, %20 : vector<1x128xi1>, vector<1x128xf32>
    %c0_11 = arith.constant 0 : index
    %c0_12 = arith.constant 0 : index
    %22 = vector.load %arg6[%c0_11, %c0_12] : memref<1x128xf32, #tpu.memory_space<vmem>>, vector<1x128xf32>
    tpu.vector_store %arg6[%c0_11, %c0_12], %21 {strides = array<i32>} : memref<1x128xf32, #tpu.memory_space<vmem>>, vector<1x128xf32>,
    return
  }
  func.func @transform_0(%arg0: i32) -> (i32, i32) {
    %c0_i32 = arith.constant 0 : i32
    %c0_i32_0 = arith.constant 0 : i32
    %c0_i32_1 = arith.constant 0 : i32
    return %c0_i32, %c0_i32_0 : i32, i32
  }
  func.func @transform_1(%arg0: i32) -> (i32, i32) {
    %c0_i32 = arith.constant 0 : i32
    %c0_i32_0 = arith.constant 0 : i32
    %c0_i32_1 = arith.constant 0 : i32
    return %c0_i32, %c0_i32_0 : i32, i32
  }
  func.func @transform_2(%arg0: i32) -> (i32, i32) {
    %c0_i32 = arith.constant 0 : i32
    %c0_i32_0 = arith.constant 0 : i32
    return %c0_i32, %arg0 : i32, i32
  }
  func.func @transform_3(%arg0: i32) -> (i32, i32) {
    %c0_i32 = arith.constant 0 : i32
    %c0_i32_0 = arith.constant 0 : i32
    return %c0_i32, %arg0 : i32, i32
  }
  func.func @transform_4(%arg0: i32) -> (i32, i32) {
    %c0_i32 = arith.constant 0 : i32
    %c0_i32_0 = arith.constant 0 : i32
    return %c0_i32, %arg0 : i32, i32
  }
  func.func @transform_5(%arg0: i32) -> (i32, i32) {
    %c0_i32 = arith.constant 0 : i32
    %c0_i32_0 = arith.constant 0 : i32
    return %c0_i32, %arg0 : i32, i32
  }
}

</mosaic_0001>

<bundles_post_ra>
// kernel: tpu_custom_call.1
= control target key start
LH: loop header
LB: loop body
LE: loop exit
PB: predicated region body
PF: predicated region fallthrough
CT: control target
= control target key end

     0   :  { %v413_v2 = vmov 0   ;;  %s529_s0 = inlined_call_operand.vmem [shape: f32[8,128], index: 0, kind: input, shape index: {}]   ;;  %s530_s1 = inlined_call_operand.vmem [shape: f32[128,1], index: 1, kind: input, shape index: {}]   ;;  %s531_s2 = inlined_call_operand.vmem [shape: f32[1,128], index: 2, kind: input, shape index: {}]   ;;  %s532_s3 = inlined_call_operand.vmem [shape: f32[1,128], index: 3, kind: input, shape index: {}]   ;;  %s533_s4 = inlined_call_operand.vmem [shape: f32[1,128], index: 4, kind: input, shape index: {}]   ;;  %s534_s5 = inlined_call_operand.hbm [shape: f32[1,128], index: 5, kind: output, shape index: {}]  }
   0x1   :  { %v24_v0 = vld [vmem:[%s530_s1 + $0x10] sm:$0xff]  ;;  %v22_v1 = vld [vmem:[%s530_s1] sm:$0xff]  ;;  %386 = vset.pattern.permute.xlu1 %v413_v2  ;;  %385 = vset.pattern.permute.xlu0 %v413_v2  ;;  %v25_v3 = vld [vmem:[%s530_s1 + $0x18] sm:$0xff] }
   0x2   :  { %56 = vperm.xlu1 %386, %v24_v0   ;;  %46 = vperm.xlu0 %385, %v22_v1   ;;  %v23_v4 = vld [vmem:[%s530_s1 + $0x8] sm:$0xff] }
   0x3   :  { %10 = vsyncpa [#allocation3], 0  ;;  %v27_v5 = vld [vmem:[%s530_s1 + $0x28] sm:$0xff]  ;;  %v26_v6 = vld [vmem:[%s530_s1 + $0x20] sm:$0xff]  ;;  %v414_v7 = vmov 0.0|0.0   ;;  %vm415_vm0 = vmmov 0  }
   0x4   :  { %355 = vmatprep.subr.bf16.mxu0 %v414_v7  ;;  %v29_v8 = vld [vmem:[%s530_s1 + $0x38] sm:$0xff]  ;;  %v28_v9 = vld [vmem:[%s530_s1 + $0x30] sm:$0xff]  ;;  %v31_v10 = vld [vmem:[%s530_s1 + $0x48] sm:$0xff]  ;;  %v416_v18 = vmov 0.0   ;;  %v417_v24 = vmov 1.0|1.0  }
   0x5   :  { %v30_v11 = vld [vmem:[%s530_s1 + $0x40] sm:$0xff]  ;;  %v33_v12 = vld [vmem:[%s530_s1 + $0x58] sm:$0xff]  ;;  %v32_v13 = vld [vmem:[%s530_s1 + $0x50] sm:$0xff]  ;;  %352 = vmatprep.mubr.msk.f32.mxu0 %vm415_vm0, %v416_v18  ;;  %s418_s6 = smov [#allocation2]  }
   0x6   :  { %61 = vperm.xlu1 %386, %v25_v3   ;;  %51 = vperm.xlu0 %385, %v23_v4   ;;  %v35_v14 = vld [vmem:[%s530_s1 + $0x68] sm:$0xff]  ;;  %v34_v15 = vld [vmem:[%s530_s1 + $0x60] sm:$0xff]  ;;  %v37_v16 = vld [vmem:[%s530_s1 + $0x78] sm:$0xff]  ;;  %s262_s7 = sshll.u32 %s418_s6, 4  ;;  %s263_s7 = int_to_ptr.vmem [resolvable:$true] %s262_s7 }
   0x7   :  { %v36_v17 = vld [vmem:[%s530_s1 + $0x70] sm:$0xff]  ;;  %v270_v21 = vld [vmem:[%s531_s2] ss:$0 sm:$0xff]  ;;  %s393_s8 = scalar_lea.vmem %s263_s7, 32  ;;  %p394_p1 = scmp.lt.s32.totalorder %s263_s7, %s263_s7 }
   0x8   :  { %v172_v37 = vld [vmem:[%s529_s0] sm:$0xff]  ;;  %s389_s0 = scalar_lea.vmem %s263_s7, 16 }
   0x9   :  { %v250_v43 = vld [vmem:[%s532_s3] sm:$0x1]  ;;  %p390_p0 = scmp.ne.s32.totalorder %s263_s7, %s389_s0  ;;  %p395_p2 = scmp.lt.s32.totalorder %s393_s8, %s389_s0 }
   0xa   :  { %71 = vperm.xlu1 %386, %v27_v5   ;;  %66 = vperm.xlu0 %385, %v26_v6   ;;  %v249_v45 = vld [vmem:[%s533_s4] sm:$0x1] }
   0xb   :  { %p396_p3 = por %p395_p2, %p394_p1 }
   0xd   :  { %p397_p4 = pnand %p396_p3, %p390_p0 }
   0xe   :  { %81 = vperm.xlu1 %386, %v29_v8   ;;  %76 = vperm.xlu0 %385, %v28_v9  }
  0x12   :  { %91 = vperm.xlu1 %386, %v31_v10   ;;  %86 = vperm.xlu0 %385, %v30_v11  }
  0x16   :  { %101 = vperm.xlu1 %386, %v33_v12   ;;  %96 = vperm.xlu0 %385, %v32_v13  }
  0x1a   :  { %111 = vperm.xlu1 %386, %v35_v14   ;;  %106 = vperm.xlu0 %385, %v34_v15  }
  0x1e   :  { %121 = vperm.xlu1 %386, %v37_v16   ;;  %116 = vperm.xlu0 %385, %v36_v17  }
  0x81   :  { %v57_v19 = vpop.permute.xlu1 %56  ;;  %v47_v20 = vpop.permute.xlu0 %46 }
  0x82   :  { %vm124_vm2 = vcmp.le.f32.partialorder %v270_v21, %v47_v20  ;;  %vm126_vm4 = vcmp.le.f32.partialorder %v270_v21, %v57_v19 }
  0x85   :  { %v62_v22 = vpop.permute.xlu1 %61  ;;  %v52_v23 = vpop.permute.xlu0 %51 }
  0x86   :  { %vm125_vm1 = vcmp.le.f32.partialorder %v270_v21, %v52_v23  ;;  %vm127_vm5 = vcmp.le.f32.partialorder %v270_v21, %v62_v22 }
  0x87   :  { %vm356_vm3 = vmpackc.low %vm125_vm1, %vm124_vm2 }
  0x88   :  { %357 = vmatpush3.bf16.msk.msra.mxu0 %vm356_vm3, %v417_v24  ;;  %vm359_vm6 = vmpackc.low %vm127_vm5, %vm126_vm4 }
  0x89   :  { %v72_v25 = vpop.permute.xlu1 %71  ;;  %v67_v26 = vpop.permute.xlu0 %66  ;;  %358 = vmatprep.subr.bf16.mxu0 %v414_v7 }
  0x8a   :  { %vm129_vm7 = vcmp.le.f32.partialorder %v270_v21, %v72_v25  ;;  %vm128_vm8 = vcmp.le.f32.partialorder %v270_v21, %v67_v26 }
  0x8b   :  { %vm362_vm9 = vmpackc.low %vm129_vm7, %vm128_vm8 }
  0x8c   :  { %360 = vmatpush3.bf16.msk.msra.mxu0 %vm359_vm6, %v417_v24 }
  0x8d   :  { %v82_v27 = vpop.permute.xlu1 %81  ;;  %v77_v28 = vpop.permute.xlu0 %76  ;;  %361 = vmatprep.subr.bf16.mxu0 %v414_v7 }
  0x8e   :  { %vm131_vm10 = vcmp.le.f32.partialorder %v270_v21, %v82_v27  ;;  %vm130_vm11 = vcmp.le.f32.partialorder %v270_v21, %v77_v28 }
  0x8f   :  { %vm365_vm12 = vmpackc.low %vm131_vm10, %vm130_vm11 }
  0x90   :  { %363 = vmatpush3.bf16.msk.msra.mxu0 %vm362_vm9, %v417_v24  ;;  %vm253_vm9 = vcmp.ne.f32.partialorder %v249_v45, 0.0 }
  0x91   :  { %v92_v29 = vpop.permute.xlu1 %91  ;;  %v87_v30 = vpop.permute.xlu0 %86  ;;  %364 = vmatprep.subr.bf16.mxu0 %v414_v7 }
  0x92   :  { %vm133_vm13 = vcmp.le.f32.partialorder %v270_v21, %v92_v29  ;;  %vm132_vm14 = vcmp.le.f32.partialorder %v270_v21, %v87_v30 }
  0x93   :  { %vm368_vm15 = vmpackc.low %vm133_vm13, %vm132_vm14 }
  0x94   :  { %366 = vmatpush3.bf16.msk.msra.mxu0 %vm365_vm12, %v417_v24 }
  0x95   :  { %v102_v31 = vpop.permute.xlu1 %101  ;;  %v97_v32 = vpop.permute.xlu0 %96  ;;  %367 = vmatprep.subr.bf16.mxu0 %v414_v7 }
  0x96   :  { %vm135_vm0 = vcmp.le.f32.partialorder %v270_v21, %v102_v31  ;;  %vm134_vm1 = vcmp.le.f32.partialorder %v270_v21, %v97_v32 }
  0x97   :  { %vm371_vm2 = vmpackc.low %vm135_vm0, %vm134_vm1 }
  0x98   :  { %369 = vmatpush3.bf16.msk.msra.mxu0 %vm368_vm15, %v417_v24 }
  0x99   :  { %v112_v33 = vpop.permute.xlu1 %111  ;;  %v107_v34 = vpop.permute.xlu0 %106  ;;  %370 = vmatprep.subr.bf16.mxu0 %v414_v7 }
  0x9a   :  { %vm137_vm3 = vcmp.le.f32.partialorder %v270_v21, %v112_v33  ;;  %vm136_vm4 = vcmp.le.f32.partialorder %v270_v21, %v107_v34 }
  0x9b   :  { %vm374_vm5 = vmpackc.low %vm137_vm3, %vm136_vm4 }
  0x9c   :  { %372 = vmatpush3.bf16.msk.msra.mxu0 %vm371_vm2, %v417_v24 }
  0x9d   :  { %v122_v35 = vpop.permute.xlu1 %121  ;;  %v117_v36 = vpop.permute.xlu0 %116  ;;  %373 = vmatprep.subr.bf16.mxu0 %v414_v7 }
  0x9e   :  { %vm139_vm6 = vcmp.le.f32.partialorder %v270_v21, %v122_v35  ;;  %vm138_vm7 = vcmp.le.f32.partialorder %v270_v21, %v117_v36 }
  0x9f   :  { %vm377_vm8 = vmpackc.low %vm139_vm6, %vm138_vm7 }
  0xa0   :  { %375 = vmatpush3.bf16.msk.msra.mxu0 %vm374_vm5, %v417_v24 }
  0xa1   :  { %376 = vmatprep.subr.bf16.mxu0 %v414_v7 }
  0xa4   :  { %378 = vmatpush3.bf16.msk.msra.mxu0 %vm377_vm8, %v417_v24 }
  0xa7   :  { %353 = vmatmul.mubr.f32.vlgmr.msra.gmra.mrb[0].mxu0 %v172_v37 }
 0x17a   :  { %v239_v38 = vpop.f32.mrb[0].mxu0 }
 0x17b   :  { %387 = vlog2.f32 %v239_v38  ;;  %v354_v39 = vpop.f32.mrb[1].mxu0 }
 0x185   :  { %v388_v40 = vpop.eup %387 }
 0x186   :  { %v244_v41 = vmul.f32 0.6931472, %v388_v40 }
 0x188   :  { %v246_v42 = vrot.slane %v244_v41, 1 }
 0x18a   :  { %v248_v44 = vsub.f32 %v244_v41, %v246_v42 }
 0x18c   :  { %v251_v46 = vsub.f32 %v250_v43, %v248_v44 }
 0x18e   :  { %v252_v47 = vmul.f32 %v251_v46, %v249_v45 }
 0x190   :  { %v254_v48 = vsel %vm253_vm9, %v252_v47, 0.0 }
 0x191   :  { %255 = vst [vmem:[#allocation2] sm:$0x1] %v254_v48 }
 0x192   :  { %400 = shalt.err (!%p397_p4)
}
 0x193   :  { %s401_s4 = scalar_lea.hbm %s534_s5, 16 }
 0x194   :  { %p402_p5 = scmp.ne.s32.totalorder %s534_s5, %s401_s4  ;;  %p405_p6 = scmp.lt.u32.totalorder %s401_s4, %s534_s5 }
 0x196   :  { %p407_p7 = pnand %p405_p6, %p402_p5 }
 0x198   :  { %410 = shalt.err (!%p407_p7)
}
 0x199   :  { %265 = dma.vmem_to_hbm [thread:$0]  %s263_s7, 16, %s534_s5, [#allocation3]  }
 0x19a   :  { %411 = dma.done.wait [#allocation3], 16  }
 0x19b   :  { %412 = vsyncadd [#allocation3], 4294967280 }
 0x19c   :  { %269 = vsyncpa [#allocation3], 1 }

</bundles_post_ra>
